<compile_context>
chip_gen: v7x
topology: tpu7x:2x2x1
jax: 0.10.0
libtpu: 0.0.40
codegen_flags: <defaults>
</compile_context>

<pallas_src>
import math
import numpy as np
import jax
import jax.numpy as jnp
from jax.experimental import pallas as pl
from jax.experimental.pallas import tpu as pltpu


# ---------------------------------------------------------------------------
# Constructor-side helper (matches get_embedding in the reference exactly)
# ---------------------------------------------------------------------------
def get_embedding(max_seq_len, embedding_dim, padding_idx=None, rel_pos_init=0):
    num_embeddings = 2 * max_seq_len + 1
    half_dim = embedding_dim // 2
    emb = math.log(10000) / (half_dim - 1)
    emb = np.exp(np.arange(half_dim, dtype=np.float32) * -emb)
    if rel_pos_init == 0:
        pos = np.arange(num_embeddings, dtype=np.float32)
    else:
        pos = np.arange(-max_seq_len, max_seq_len + 1, dtype=np.float32)
    emb = pos[:, None] * emb[None, :]
    emb = np.concatenate([np.sin(emb), np.cos(emb)], axis=1).reshape(num_embeddings, -1)
    if embedding_dim % 2 == 1:
        emb = np.concatenate([emb, np.zeros((num_embeddings, 1), np.float32)], axis=1)
    if padding_idx is not None:
        emb[padding_idx, :] = 0.0
    return jnp.asarray(emb, jnp.float32)          # (2*max_len+1, H)


def build_ape_params(fusion_func, hidden_size, pos_norm=False, max_len=51, key=None):
    """Mirrors Absolute_Position_Embedding.__init__ (pe table, optional norm, proj)."""
    pe = get_embedding(max_len, hidden_size)                       # (L, H)
    if pos_norm:
        pe = pe / pe.sum(axis=-1, keepdims=True)
    params = {"pe": pe}
    if "concat" in fusion_func:
        k_w, k_b = jax.random.split(key)
        bound = 1.0 / math.sqrt(2 * hidden_size)                   # nn.Linear default init
        params["proj_W"] = jax.random.uniform(
            k_w, (hidden_size, 2 * hidden_size), jnp.float32, -bound, bound)
        params["proj_b"] = jax.random.uniform(
            k_b, (hidden_size,), jnp.float32, -bound, bound)
    return params


# ---------------------------------------------------------------------------
# Pallas kernels
# ---------------------------------------------------------------------------
def _ape_add_kernel(x_ref, pe_ref, o_ref):
    # x_ref/o_ref: (1, S, H);  pe_ref: (S, H) shared across the batch grid.
    o_ref[0] = x_ref[0] + pe_ref[...]


def _ape_concat_kernel(x_ref, pe_ref, wx_ref, wp_ref, b_ref, o_ref):
    # Linear(cat([x, pe], -1)) == x @ Wx^T + pe @ Wp^T + b   (no in-kernel concat).
    acc = jnp.dot(x_ref[0], wx_ref[...], preferred_element_type=jnp.float32)
    acc = acc + jnp.dot(pe_ref[...], wp_ref[...], preferred_element_type=jnp.float32)
    o_ref[0] = (acc + b_ref[...]).astype(o_ref.dtype)


# ---------------------------------------------------------------------------
# Forward wrapper
# ---------------------------------------------------------------------------
def ape_forward(inp, params, fusion_func):
    """inp: (B, S, H) float32.  Matches Absolute_Position_Embedding.forward."""
    B, S, H = inp.shape
    pe_seq = params["pe"][:S]                                      # == pe[:, :S]

    if "add" in fusion_func:
        return pl.pallas_call(
            _ape_add_kernel,
            out_shape=jax.ShapeDtypeStruct((B, S, H), inp.dtype),
            grid=(B,),
            in_specs=[
                pl.BlockSpec((1, S, H), lambda b: (b, 0, 0)),      # x
                pl.BlockSpec((S, H), lambda b: (0, 0)),            # pe (resident)
            ],
            out_specs=pl.BlockSpec((1, S, H), lambda b: (b, 0, 0)),
            compiler_params=pltpu.CompilerParams(
                dimension_semantics=("parallel",)),
        )(inp, pe_seq)

    # 'concat' fusion: split the (H, 2H) projection into the x and pe halves.
    W = params["proj_W"]                                           # (H, 2H)
    WxT = jnp.transpose(W[:, :H])                                  # (H, H)
    WpT = jnp.transpose(W[:, H:])                                  # (H, H)
    bias = params["proj_b"][None, :]                               # (1, H)

    return pl.pallas_call(
        _ape_concat_kernel,
        out_shape=jax.ShapeDtypeStruct((B, S, H), inp.dtype),
        grid=(B,),
        in_specs=[
            pl.BlockSpec((1, S, H), lambda b: (b, 0, 0)),          # x
            pl.BlockSpec((S, H), lambda b: (0, 0)),                # pe     (resident)
            pl.BlockSpec((H, H), lambda b: (0, 0)),                # Wx^T   (resident)
            pl.BlockSpec((H, H), lambda b: (0, 0)),                # Wp^T   (resident)
            pl.BlockSpec((1, H), lambda b: (0, 0)),                # bias   (resident)
        ],
        out_specs=pl.BlockSpec((1, S, H), lambda b: (b, 0, 0)),
        compiler_params=pltpu.CompilerParams(
            dimension_semantics=("parallel",)),
    )(inp, pe_seq, WxT, WpT, bias)


# ---------------------------------------------------------------------------
if __name__ == "__main__":
    key = jax.random.PRNGKey(0)
    k_inp, k_proj = jax.random.split(key)

    B, S, H = 2, 8, 32
    max_len = 51
    inp = jax.random.normal(k_inp, (B, S, H), jnp.float32)

    # --- fusion_func = 'add' -------------------------------------------------
    p_add = build_ape_params("add", H, pos_norm=False, max_len=max_len)
    out_add = jax.block_until_ready(ape_forward(inp, p_add, "add"))
    ref_add = np.asarray(inp) + np.asarray(p_add["pe"][:S])[None]
    np.testing.assert_allclose(np.asarray(out_add), ref_add, rtol=1e-6, atol=1e-6)

    # --- fusion_func = 'concat' (with pos_norm=True) -------------------------
    p_cat = build_ape_params("concat", H, pos_norm=True, max_len=max_len, key=k_proj)
    out_cat = jax.block_until_ready(ape_forward(inp, p_cat, "concat"))

    pe_np = np.asarray(p_cat["pe"][:S])
    cat_np = np.concatenate(
        [np.asarray(inp), np.broadcast_to(pe_np[None], (B, S, H))], axis=-1)
    ref_cat = cat_np @ np.asarray(p_cat["proj_W"]).T + np.asarray(p_cat["proj_b"])
    np.testing.assert_allclose(np.asarray(out_cat), ref_cat, rtol=2e-3, atol=2e-3)

    print("KERNEL_OK")
</pallas_src>

<mosaic_0001>
module attributes {stable_mosaic.version = 11 : i64} {
  func.func @_ape_add_kernel(%arg0: i32, %arg1: memref<1x8x32xf32, #tpu.memory_space<vmem>>, %arg2: memref<8x32xf32, #tpu.memory_space<vmem>>, %arg3: memref<1x8x32xf32, #tpu.memory_space<vmem>>) attributes {dimension_semantics = [#tpu.dimension_semantics<parallel>], iteration_bounds = array<i64: 2>, scalar_prefetch = 0 : i64, scratch_operands = 0 : i64, tpu.core_type = #tpu.core_type<tc>, window_params = [{transform_indices = @transform_0, window_bounds = array<i64: 1, 8, 32>}, {pipeline_mode = #tpu.pipeline_mode<synchronous>, transform_indices = @transform_1, window_bounds = array<i64: 8, 32>}, {transform_indices = @transform_2, window_bounds = array<i64: 1, 8, 32>}]} {
    %c0 = arith.constant 0 : index
    %c0_0 = arith.constant 0 : index
    %c0_1 = arith.constant 0 : index
    %0 = vector.load %arg1[%c0, %c0_0, %c0_1] : memref<1x8x32xf32, #tpu.memory_space<vmem>>, vector<1x8x32xf32>
    %1 = vector.shape_cast %0 : vector<1x8x32xf32> to vector<8x32xf32>
    %c0_2 = arith.constant 0 : index
    %c0_3 = arith.constant 0 : index
    %2 = vector.load %arg2[%c0_2, %c0_3] : memref<8x32xf32, #tpu.memory_space<vmem>>, vector<8x32xf32>
    %3 = arith.addf %1, %2 : vector<8x32xf32>
    %c0_4 = arith.constant 0 : index
    %c0_5 = arith.constant 0 : index
    %c0_6 = arith.constant 0 : index
    %4 = vector.load %arg3[%c0_4, %c0_5, %c0_6] : memref<1x8x32xf32, #tpu.memory_space<vmem>>, vector<1x8x32xf32>
    %5 = vector.shape_cast %4 : vector<1x8x32xf32> to vector<8x32xf32>
    %6 = vector.shape_cast %3 : vector<8x32xf32> to vector<1x8x32xf32>
    tpu.vector_store %arg3[%c0_4, %c0_5, %c0_6], %6 {strides = array<i32>} : memref<1x8x32xf32, #tpu.memory_space<vmem>>, vector<1x8x32xf32>,
    return
  }
  func.func @transform_0(%arg0: i32) -> (i32, i32, i32) {
    %c0_i32 = arith.constant 0 : i32
    %c0_i32_0 = arith.constant 0 : i32
    %c0_i32_1 = arith.constant 0 : i32
    return %arg0, %c0_i32, %c0_i32_0 : i32, i32, i32
  }
  func.func @transform_1(%arg0: i32) -> (i32, i32) {
    %c0_i32 = arith.constant 0 : i32
    %c0_i32_0 = arith.constant 0 : i32
    %c0_i32_1 = arith.constant 0 : i32
    return %c0_i32, %c0_i32_0 : i32, i32
  }
  func.func @transform_2(%arg0: i32) -> (i32, i32, i32) {
    %c0_i32 = arith.constant 0 : i32
    %c0_i32_0 = arith.constant 0 : i32
    %c0_i32_1 = arith.constant 0 : i32
    return %arg0, %c0_i32, %c0_i32_0 : i32, i32, i32
  }
}

</mosaic_0001>

<bundles_post_ra>
// kernel: tpu_custom_call.1
= control target key start
LH: loop header
LB: loop body
LE: loop exit
PB: predicated region body
PF: predicated region fallthrough
CT: control target
= control target key end

     0   :  { %7 = vsyncpa [#allocation3], 0  ;;  %s691_s0 = inlined_call_operand.hbm [shape: f32[2,8,32], index: 0, kind: input, shape index: {}]   ;;  %s692_s1 = inlined_call_operand.hbm [shape: f32[8,32], index: 1, kind: input, shape index: {}]   ;;  %s693_s2 = inlined_call_operand.hbm [shape: f32[2,8,32], index: 2, kind: output, shape index: {}]  }
   0x1   :  { %9 = vsyncpa [#allocation3 + $0x1], 0 }
   0x2   :  { %10 = vsyncpa [#allocation6], 0 }
   0x3   :  { %11 = vsyncpa [#allocation4], 0 }
   0x4   :  { %13 = vsyncpa [#allocation4 + $0x1], 0  ;;  %s490_s9 = smov 0   ;;  %s492_s10 = smov 0  }
   0x5   :  { %s494_s11 = smov 0   ;;  %s496_s12 = smov 0  }
   0x6 LB: > { %s511_s13 = sadd.s32 4294967295, %s470_s12   ;;  %s271_s14 = sadd.s32 4294967294, %s470_s12   ;;  %s470_s12 = sphi %s496_s12, %s717_s12   ;;  %s466_s11 = sphi %s494_s11, %s716_s11   ;;  %s462_s10 = sphi %s492_s10, %s715_s10   ;;  %s458_s9 = sphi %s490_s9, %s714_s9  }
   0x7   : > { %p39_p0 = scmp.ne.s32.totalorder %s462_s10, %s458_s9  ;;  %p694_p1 = scmp.eq.s32.totalorder %s511_s13, 0 }
   0x8   : > { %p90_p3 = scmp.eq.s32.totalorder %s271_s14, 1  ;;  %p272_p5 = scmp.ge.s32.totalorder %s470_s12, 1 }
   0x9   : > { %p520_p4 = por %p694_p1, %p39_p0  ;;  %p97_p7 = scmp.lt.s32.totalorder %s470_s12, 3 }
   0xa   : > { %p525_p6 = por %p90_p3, %p39_p0  ;;  %s472_s18 = smov [#allocation5]  }
   0xb   : > { %s697_s15 = scalar_select %p520_p4, 1, 0 }
   0xc   : > { %s698_s16 = scalar_select %p525_p6, 1, 0 }
   0xd   : > { %p530_p8 = pnand %p272_p5, %p97_p7  ;;  %s110_s19 = sshll.u32 %s472_s18, 4  ;;  %s111_s19 = int_to_ptr.vmem [resolvable:$true] %s110_s19 }
   0xe   : > { %s538_s20 = sadd.s32 1, %s470_s12   ;;  %s26_s24 = sadd.s32 1, %s466_s11 }
   0xf   : > { %s699_s17 = scalar_select %p530_p8, 1, 0 }
  0x10   : > { %p293_p10 = pneg %p530_p8  ;;  %s23_s22 = ssub.s32 %s470_s12, %s538_s20 }
  0x11   : > { %p548_p12 = scmp.eq.s32.totalorder %s23_s22, 0  ;;  %s342_s27 = scalar_lea.hbm %s692_s1, 128 }
  0x12   : > { %p542_p11 = pnand %p293_p10, %p694_p1  ;;  %p343_p0 = scmp.ne.s32.totalorder %s692_s1, %s342_s27 }
  0x13   : > { %s701_s23 = scalar_select %p548_p12, 1, 0 }
  0x14   : > { %p344_p3 = pneg %p542_p11  ;;  %p349_p10 = scmp.lt.u32.totalorder %s342_s27, %s692_s1 }
  0x16   : > { %p345_p5 = pnand %p344_p3, %p343_p0 }
  0x18   : > { %p346_p7 = pneg %p345_p5 }
  0x1a   : > { %p351_p9 = pnand %p349_p10, %p346_p7 }
  0x1c   : > { %354 = shalt.err (!%p351_p9)
}
  0x1d   : > { %s355_s4 = scalar_lea.vmem %s111_s19, 128  ;;  %p363_p6 = scmp.lt.s32.totalorder %s111_s19, %s111_s19 }
  0x1e   : > { %p356_p1 = scmp.ne.s32.totalorder %s111_s19, %s355_s4  ;;  %p364_p4 = scmp.lt.s32.totalorder %s355_s4, %s355_s4 }
  0x20   : > { %p358_p2 = pnand %p356_p1, %p344_p3  ;;  %p365_p8 = por %p364_p4, %p363_p6 }
  0x22   : > { %p359_p13 = pneg %p358_p2 }
  0x24   : > { %p366_p12 = pnand %p365_p8, %p359_p13 }
  0x26   : > { %369 = shalt.err (!%p366_p12)
}
  0x27   : > { %296 = dma.hbm_to_vmem [thread:$0]  (!%p542_p11), %s692_s1, 128, %s111_s19, [#allocation6]  }
  0x28   : > { %p702_p1 = scmp.ne.s32.totalorder %s701_s23, 0  ;;  %p34_p2 = scmp.eq.s32.totalorder %s470_s12, 0 }
  0x29   : > { %p703_p4 = scmp.ne.s32.totalorder %s466_s11, %s462_s10  ;;  %p704_p6 = scmp.eq.s32.totalorder %s511_s13, 1 }
  0x2a   : > { %s574_s7 = scalar_select %p702_p1, %s466_s11, %s26_s24  }
  0x2b   : > { %p582_p8 = por %p704_p6, %p703_p4  ;;  %p306_p9 = scmp.lt.s32.totalorder %s470_s12, 2 }
  0x2c   : > { %s121_s14 = sand.u32 1, %s466_s11   ;;  %p706_p12 = pmov %p703_p4 }
  0x2d   : > { %s275_s18 = sshll.u32 %s121_s14, 3  ;;  %s276_s21 = sshll.u32 %s470_s12, 7 }
  0x2e   : > { %p35_p13 = por %p34_p2, %p706_p12  ;;  %s595_s19 = scalar_lea.hbm %s691_s0, %s276_s21 }
  0x2f   : > { %s125_s23 = scalar_lea.vmem [#allocation2], %s275_s18  ;;  %s122_s27 = scalar_lea.sflag [#allocation3], %s121_s14 }
  0x30   : > { %s132_s24 = sshll.u32 %s125_s23, 4  ;;  %p597_p11 = pnand %p306_p9, %p35_p13  ;;  %s601_s24 = int_to_ptr.vmem [resolvable:$true] %s132_s24 }
  0x31   : > { %s370_s28 = scalar_lea.hbm %s595_s19, 128  ;;  %s375_s3 = scalar_lea.hbm %s691_s0, 256 }
  0x32   : > { %p371_p0 = scmp.ne.s32.totalorder %s595_s19, %s370_s28  ;;  %p372_p3 = pneg %p597_p11 }
  0x33   : > { %p376_p10 = scmp.lt.u32.totalorder %s595_s19, %s691_s0  ;;  %p377_p1 = scmp.lt.u32.totalorder %s375_s3, %s370_s28 }
  0x34   : > { %p373_p5 = pnand %p372_p3, %p371_p0  ;;  %p379_p4 = scmp.lt.u32.totalorder %s370_s28, %s595_s19 }
  0x35   : > { %p378_p2 = por %p377_p1, %p376_p10 }
  0x36   : > { %p374_p7 = pneg %p373_p5 }
  0x37   : > { %p380_p6 = por %p379_p4, %p378_p2 }
  0x39   : > { %p381_p9 = pnand %p380_p6, %p374_p7 }
  0x3b   : > { %384 = shalt.err (!%p381_p9)
}
  0x3c   : > { %s385_s6 = scalar_lea.vmem %s601_s24, 128  ;;  %s473_s14 = smov [#allocation2]  }
  0x3d   : > { %p386_p12 = scmp.ne.s32.totalorder %s601_s24, %s385_s6  ;;  %s390_s18 = sshll.u32 %s473_s14, 4  ;;  %s391_s18 = int_to_ptr.vmem [resolvable:$false] %s390_s18 }
  0x3e   : > { %s392_s21 = scalar_lea.vmem %s391_s18, 256  ;;  %p393_p5 = scmp.lt.s32.totalorder %s601_s24, %s391_s18 }
  0x3f   : > { %p388_p13 = pnand %p386_p12, %p372_p3  ;;  %p394_p10 = scmp.lt.s32.totalorder %s392_s21, %s385_s6 }
  0x41   : > { %p389_p0 = pneg %p388_p13  ;;  %p395_p1 = por %p394_p10, %p393_p5 }
  0x43   : > { %p396_p2 = pnand %p395_p1, %p389_p0 }
  0x45   : > { %399 = shalt.err (!%p396_p2)
}
  0x46   : > { %300 = dma.hbm_to_vmem [thread:$0]  (!%p597_p11), %s595_s19, 128, %s601_s24, %s122_s27  }
  0x47   : > { %p708_p7 = scmp.ne.s32.totalorder %s699_s17, 0 }
  0x48   : > { %s631_s22 = sand.u32 (!%p708_p7), 1, %s462_s10   ;;  %p709_p3 = scmp.ne.s32.totalorder (!%p708_p7), %s697_s15, 0 }
  0x49   : > { %141 = sbr.rel (%p708_p7) target bundleno = 109 (0x6d), region = 28  ;;  %s278_s25 = sshll.u32 (!%p708_p7), %s631_s22, 3 }
  0x4a   : > { %s144_s23 = scalar_lea.sflag (!%p708_p7), [#allocation3], %s631_s22  ;;  %s147_s28 = scalar_lea.vmem (!%p708_p7), [#allocation2], %s278_s25 }
  0x50   : > { %445 = dma.done.wait (%p709_p3), %s144_s23, 128  }
  0x51   : > { %447 = vsyncadd (%p709_p3), %s144_s23, 4294967168  ;;  %p710_p4 = scmp.eq.s32.totalorder %s511_s13, 0 }
  0x53   : > { %449 = dma.done.wait (%p710_p4), [#allocation6], 128   ;;  %p711_p11 = pmov %p710_p4 }
  0x54   : > { %s171_s17 = scalar_lea.vmem [#allocation7], %s278_s25  ;;  %s282_s24 = sshll.u32 %s511_s13, 7  ;;  %v172_v0 = vld [vmem:[%s147_s28] sm:$0xff]  ;;  %v173_v1 = vld [vmem:[#allocation5] sm:$0xff]  ;;  %vm175_vm0 = vcmask 261120  }
  0x55   : > { %451 = vsyncadd (%p711_p11), [#allocation6], 4294967168  ;;  %s191_s19 = sshll.u32 %s171_s17, 4  ;;  %v174_v2 = vadd.f32 %v173_v1, %v172_v0  ;;  %s649_s27 = scalar_lea.hbm %s693_s2, %s282_s24  ;;  %s644_s19 = int_to_ptr.vmem [resolvable:$true] %s191_s19 }
  0x56   : > { %s178_s29 = scalar_lea.sflag [#allocation4], %s631_s22  ;;  %s400_s30 = scalar_lea.vmem %s644_s19, 128 }
  0x57   : > { %176 = vst.msk [vmem:[%s171_s17] sm:$0xff] %vm175_vm0, %v174_v2  ;;  %p401_p6 = scmp.ne.s32.totalorder %s644_s19, %s400_s30  ;;  %s474_s13 = smov [#allocation7]  }
  0x58   : > { %s404_s3 = sshll.u32 %s474_s13, 4  ;;  %s405_s3 = int_to_ptr.vmem [resolvable:$false] %s404_s3 }
  0x59   : > { %p402_p9 = pnand %p401_p6, %p582_p8  ;;  %s406_s4 = scalar_lea.vmem %s405_s3, 256 }
  0x5a   : > { %p407_p13 = scmp.lt.s32.totalorder %s644_s19, %s405_s3  ;;  %p408_p0 = scmp.lt.s32.totalorder %s406_s4, %s400_s30 }
  0x5b   : > { %p403_p12 = pneg %p402_p9 }
  0x5c   : > { %p409_p5 = por %p408_p0, %p407_p13 }
  0x5e   : > { %p410_p10 = pnand %p409_p5, %p403_p12 }
  0x60   : > { %413 = shalt.err (!%p410_p10)
}
  0x61   : > { %s414_s5 = scalar_lea.hbm %s649_s27, 128  ;;  %s418_s18 = scalar_lea.hbm %s693_s2, 256 }
  0x62   : > { %p415_p1 = scmp.ne.s32.totalorder %s649_s27, %s414_s5  ;;  %p419_p3 = scmp.lt.u32.totalorder %s649_s27, %s693_s2 }
  0x63   : > { %p420_p4 = scmp.lt.u32.totalorder %s418_s18, %s414_s5  ;;  %p422_p6 = scmp.lt.u32.totalorder %s414_s5, %s649_s27 }
  0x64   : > { %p416_p2 = pnand %p415_p1, %p582_p8 }
  0x65   : > { %p421_p11 = por %p420_p4, %p419_p3 }
  0x66   : > { %p417_p7 = pneg %p416_p2 }
  0x67   : > { %p423_p9 = por %p422_p6, %p421_p11 }
  0x69   : > { %p424_p12 = pnand %p423_p9, %p417_p7 }
  0x6b   : > { %427 = shalt.err (!%p424_p12)
}
  0x6c   : > { %291 = dma.vmem_to_hbm [thread:$0]  (%p582_p8), %s644_s19, 128, %s649_s27, %s178_s29  }
  0x6d PF: > { %s203_s25 = sand.u32 1, %s458_s9   ;;  %p712_p13 = scmp.ne.s32.totalorder %s698_s16, 0 }
  0x6e   : > { %p713_p0 = scmp.ge.s32.totalorder %s470_s12, 2  ;;  %s204_s23 = scalar_lea.sflag [#allocation4], %s203_s25 }
  0x70   : > { %p302_p5 = pnand %p713_p0, %p712_p13 }
  0x72   : > { %453 = dma.done.wait (!%p302_p5), %s204_s23, 128  }
  0x73   : > { %455 = vsyncadd (!%p302_p5), %s204_s23, 4294967168  ;;  %p16_p10 = scmp.ge.s32.totalorder %s538_s20, 4   ;;  %s714_s9 = smov %s462_s10 }
  0x74   : > { %s715_s10 = smov %s466_s11  ;;  %s716_s11 = smov %s574_s7 }
  0x75   : > { %s717_s12 = smov %s538_s20  ;;  %18 = sbr.rel (!%p16_p10) target bundleno = 6 (0x6), region = 77 }
  0x7c   :  { %209 = vsyncpa [#allocation3], 1 }
  0x7d   :  { %211 = vsyncpa [#allocation3 + $0x1], 1 }
  0x7e   :  { %212 = vsyncpa [#allocation6], 1 }
  0x7f   :  { %213 = vsyncpa [#allocation4], 1 }
  0x80   :  { %215 = vsyncpa [#allocation4 + $0x1], 1 }

</bundles_post_ra>
